<compile_context>
chip_gen: v5e
topology: v5e:2x2
jax: 0.10.0
libtpu: 0.0.40
codegen_flags: <defaults>
</compile_context>

<pallas_src>
import functools

import jax
import jax.numpy as jnp
from jax import lax
from jax.experimental import pallas as pl
from jax.experimental.pallas import tpu as pltpu

LANES = 128
MAX_BLOCK_ROWS = 8192   # (8192, 128) f32 block = 4 MiB per pipeline buffer.
SLAB_ROWS = 1024        # in-kernel slab; temporaries stay ~O(1 MiB) per slab.


def _reduce_rows_to_tile(x, nrows):
    """(nrows, 128) f32 -> (8, 128) partial sums.

    When nrows is a multiple of 8 this is a layout-preserving sublane fold followed by
    pure elementwise vreg adds (VALU only).  The fallback (tiny single-block inputs
    only) does one cross-sublane reduce and places it in row 0 of an (8, 128) tile.
    """
    if nrows % 8 == 0:
        return x.reshape(nrows // 8, 8, LANES).sum(axis=0)
    colsum = jnp.sum(x, axis=0, keepdims=True)                      # (1, 128)
    row_ids = lax.broadcasted_iota(jnp.int32, (8, LANES), 0)
    return jnp.where(row_ids == 0, colsum, 0.0)


def _rel_thresh_kernel(p_ref, t_ref, out_ref, *, threshold, eps,
                       block_rows, slab_rows, need_mask, rows_in_last):
    """Per grid step: write (2, 8, 128) partials (sum of selected |p-t|, selected count)."""
    num_slabs = block_rows // slab_rows   # wrapper guarantees exact division

    if need_mask:
        is_last = pl.program_id(0) == pl.num_programs(0) - 1
        # Number of valid rows in THIS block (only the ragged last block differs).
        valid_rows = jnp.where(is_last, rows_in_last, block_rows)

    s_acc = jnp.zeros((8, LANES), jnp.float32)
    c_acc = jnp.zeros((8, LANES), jnp.float32)

    for j in range(num_slabs):            # static unroll; indices are constants
        r0 = j * slab_rows
        p = p_ref[pl.ds(r0, slab_rows), :].astype(jnp.float32)
        t = t_ref[pl.ds(r0, slab_rows), :].astype(jnp.float32)

        dist = jnp.abs(p - t)
        base = jnp.abs(t + eps)
        # dist / base >= threshold rewritten as multiply-compare (both sides >= 0).
        # "(dist + base) > 0" reproduces the base==0 & dist==0 case of the original
        # (0/0 = NaN >= thr -> False); all other cases are identical (up to 1 ulp at
        # the exact threshold boundary).
        sel = (dist >= threshold * base) & ((dist + base) > 0.0)

        contrib = jnp.where(sel, dist, 0.0)
        counts = sel.astype(jnp.float32)

        if need_mask:
            # Only the ragged last grid block can contain out-of-bounds garbage rows;
            # neutralize them BEFORE accumulating (where() does not propagate NaN/Inf
            # from the untaken branch).
            row_ids = r0 + lax.broadcasted_iota(jnp.int32, (slab_rows, LANES), 0)
            ok = row_ids < valid_rows
            contrib = jnp.where(ok, contrib, 0.0)
            counts = jnp.where(ok, counts, 0.0)

        s_acc = s_acc + _reduce_rows_to_tile(contrib, slab_rows)
        c_acc = c_acc + _reduce_rows_to_tile(counts, slab_rows)

    out_ref[0, 0] = s_acc
    out_ref[0, 1] = c_acc


def relative_threshold_reg_loss(preds, targets, threshold, eps=1e-07):
    assert preds.shape == targets.shape, "dim of preds and targets are different"

    n = int(preds.size)
    p_flat = preds.reshape(-1)      # keep original dtype; cast happens in-kernel
    t_flat = targets.reshape(-1)

    rows = n // LANES
    tail = n - rows * LANES

    # <128-element tail handled in plain JAX (tiny) -> no full-array pad copy.
    if tail:
        pt = p_flat[rows * LANES:].astype(jnp.float32)
        tt = t_flat[rows * LANES:].astype(jnp.float32)
        d = jnp.abs(pt - tt)
        b = jnp.abs(tt + eps)
        sel = (d >= threshold * b) & ((d + b) > 0.0)
        tail_sum = jnp.sum(jnp.where(sel, d, 0.0))
        tail_cnt = jnp.sum(sel).astype(jnp.int32)
    else:
        tail_sum = jnp.float32(0.0)
        tail_cnt = jnp.int32(0)

    if rows == 0:
        # Entire input is smaller than one lane row.
        return tail_sum / tail_cnt.astype(jnp.float32)

    p2 = (p_flat[: rows * LANES] if tail else p_flat).reshape(rows, LANES)
    t2 = (t_flat[: rows * LANES] if tail else t_flat).reshape(rows, LANES)

    # Block sizing (perf review): big lane-dense blocks amortize the ~0.35 us/step grid
    # overhead; the in-kernel slab loop keeps temporaries out of VMEM so it fits v7x.
    if rows >= MAX_BLOCK_ROWS:
        block_rows = MAX_BLOCK_ROWS
    elif rows >= SLAB_ROWS:
        block_rows = (rows // SLAB_ROWS) * SLAB_ROWS
    else:
        block_rows = rows               # block equals full array dim (always legal)
    slab_rows = min(SLAB_ROWS, block_rows)

    num_blocks = -(-rows // block_rows)
    need_mask = (rows % block_rows) != 0
    rows_in_last = rows - (num_blocks - 1) * block_rows

    kernel = functools.partial(
        _rel_thresh_kernel,
        threshold=float(threshold), eps=float(eps),
        block_rows=block_rows, slab_rows=slab_rows,
        need_mask=need_mask, rows_in_last=rows_in_last,
    )

    partials = pl.pallas_call(
        kernel,
        out_shape=jax.ShapeDtypeStruct((num_blocks, 2, 8, LANES), jnp.float32),
        grid=(num_blocks,),
        in_specs=[pl.BlockSpec((block_rows, LANES), lambda i: (i, 0)),
                  pl.BlockSpec((block_rows, LANES), lambda i: (i, 0))],
        out_specs=pl.BlockSpec((1, 2, 8, LANES), lambda i: (i, 0, 0, 0)),
        compiler_params=pltpu.CompilerParams(
            # No carried state across the grid -> safe to mark parallel; on v7x the
            # megacore splits the row range across both TensorCores automatically.
            dimension_semantics=("parallel",),
            # 16 MiB of input double-buffers at the 8192-row tile + small slab temps;
            # raises v5e's 16 MiB default, matches the v6e/v7x 32 MiB default.
            vmem_limit_bytes=32 << 20,
        ),
    )(p2, t2)

    # Tiny final reduction + divide in the wrapper.  Counts are exact per block in f32
    # (<= 2^20 each) and summed as int32 so the global count stays exact.
    total_sum = jnp.sum(partials[:, 0]) + tail_sum
    total_cnt = jnp.sum(partials[:, 1].astype(jnp.int32)) + tail_cnt
    # 0/0 -> NaN matches torch.mean of an empty selection.
    return total_sum / total_cnt.astype(jnp.float32)


def _reference_loss(preds, targets, threshold, eps=1e-07):
    dist = jnp.abs(preds - targets).reshape(-1).astype(jnp.float32)
    base = jnp.abs(targets.reshape(-1).astype(jnp.float32) + eps)
    rel = dist / base
    mask = rel >= threshold
    cnt = jnp.sum(mask)
    return jnp.sum(jnp.where(mask, dist, 0.0)) / cnt.astype(jnp.float32)


if __name__ == "__main__":
    key = jax.random.PRNGKey(0)
    k1, k2, k3, k4, k5, k6 = jax.random.split(key, 6)
    threshold = 0.1

    # (n, c, h, w) as implied by the module; lane-aligned -> zero-copy single-block path.
    shape = (2, 4, 16, 16)
    preds = jax.random.normal(k1, shape, dtype=jnp.float32)
    targets = jax.random.normal(k2, shape, dtype=jnp.float32)
    loss = jax.block_until_ready(relative_threshold_reg_loss(preds, targets, threshold))
    ref = jax.block_until_ready(_reference_loss(preds, targets, threshold))
    assert jnp.allclose(loss, ref, rtol=1e-5, atol=1e-6), (loss, ref)

    # Tiny odd shape: non-lane-aligned tail + row count not a multiple of 8.
    shape2 = (3, 5, 7, 11)
    p_odd = jax.random.normal(k3, shape2, dtype=jnp.float32)
    t_odd = jax.random.normal(k4, shape2, dtype=jnp.float32)
    loss2 = jax.block_until_ready(relative_threshold_reg_loss(p_odd, t_odd, threshold))
    ref2 = jax.block_until_ready(_reference_loss(p_odd, t_odd, threshold))
    assert jnp.allclose(loss2, ref2, rtol=1e-5, atol=1e-6), (loss2, ref2)

    # Moderate ragged shape: multi-block grid + ragged last block + JAX-side tail.
    shape3 = (2, 5, 110, 129)
    p_big = jax.random.normal(k5, shape3, dtype=jnp.float32)
    t_big = jax.random.normal(k6, shape3, dtype=jnp.float32)
    loss3 = jax.block_until_ready(relative_threshold_reg_loss(p_big, t_big, threshold))
    ref3 = jax.block_until_ready(_reference_loss(p_big, t_big, threshold))
    assert jnp.allclose(loss3, ref3, rtol=1e-5, atol=1e-6), (loss3, ref3)

    print("KERNEL_OK")
</pallas_src>

<mosaic_0001>
module attributes {stable_mosaic.version = 11 : i64} {
  func.func @_rel_thresh_kernel(%arg0: i32, %arg1: memref<16x128xf32, #tpu.memory_space<vmem>>, %arg2: memref<16x128xf32, #tpu.memory_space<vmem>>, %arg3: memref<1x2x8x128xf32, #tpu.memory_space<vmem>>) attributes {dimension_semantics = [#tpu.dimension_semantics<parallel>], iteration_bounds = array<i64: 1>, scalar_prefetch = 0 : i64, scratch_operands = 0 : i64, tpu.core_type = #tpu.core_type<tc>, window_params = [{transform_indices = @transform_0, window_bounds = array<i64: 16, 128>}, {transform_indices = @transform_1, window_bounds = array<i64: 16, 128>}, {transform_indices = @transform_2, window_bounds = array<i64: 1, 2, 8, 128>}]} {
    %cst = arith.constant 0.000000e+00 : f32
    %0 = vector.broadcast %cst : f32 to vector<8x128xf32>
    %cst_0 = arith.constant 0.000000e+00 : f32
    %1 = vector.broadcast %cst_0 : f32 to vector<8x128xf32>
    %c0 = arith.constant 0 : index
    %c0_1 = arith.constant 0 : index
    %2 = vector.load %arg1[%c0, %c0_1] : memref<16x128xf32, #tpu.memory_space<vmem>>, vector<16x128xf32>
    %c0_2 = arith.constant 0 : index
    %c0_3 = arith.constant 0 : index
    %3 = vector.load %arg2[%c0_2, %c0_3] : memref<16x128xf32, #tpu.memory_space<vmem>>, vector<16x128xf32>
    %4 = arith.subf %2, %3 : vector<16x128xf32>
    %5 = math.absf %4 : vector<16x128xf32>
    %cst_4 = arith.constant 1.000000e-07 : f32
    %6 = vector.broadcast %cst_4 : f32 to vector<16x128xf32>
    %7 = arith.addf %3, %6 : vector<16x128xf32>
    %8 = math.absf %7 : vector<16x128xf32>
    %cst_5 = arith.constant 1.000000e-01 : f32
    %9 = vector.broadcast %cst_5 : f32 to vector<16x128xf32>
    %10 = arith.mulf %9, %8 : vector<16x128xf32>
    %11 = arith.cmpf oge, %5, %10 : vector<16x128xf32>
    %12 = arith.addf %5, %8 : vector<16x128xf32>
    %cst_6 = arith.constant 0.000000e+00 : f32
    %13 = vector.broadcast %cst_6 : f32 to vector<16x128xf32>
    %14 = arith.cmpf ogt, %12, %13 : vector<16x128xf32>
    %15 = arith.andi %11, %14 : vector<16x128xi1>
    %cst_7 = arith.constant 0.000000e+00 : f32
    %16 = vector.broadcast %cst_7 : f32 to vector<16x128xf32>
    %17 = arith.select %15, %5, %16 : vector<16x128xi1>, vector<16x128xf32>
    %18 = arith.extui %15 : vector<16x128xi1> to vector<16x128xi32>
    %19 = arith.sitofp %18 : vector<16x128xi32> to vector<16x128xf32>
    %20 = vector.shape_cast %17 : vector<16x128xf32> to vector<2x8x128xf32>
    %cst_8 = arith.constant dense<0.000000e+00> : vector<8x128xf32>
    %21 = vector.multi_reduction <add>, %20, %cst_8 [0] : vector<2x8x128xf32> to vector<8x128xf32>
    %22 = arith.addf %0, %21 : vector<8x128xf32>
    %23 = vector.shape_cast %19 : vector<16x128xf32> to vector<2x8x128xf32>
    %cst_9 = arith.constant dense<0.000000e+00> : vector<8x128xf32>
    %24 = vector.multi_reduction <add>, %23, %cst_9 [0] : vector<2x8x128xf32> to vector<8x128xf32>
    %25 = arith.addf %1, %24 : vector<8x128xf32>
    %c0_10 = arith.constant 0 : index
    %c0_11 = arith.constant 0 : index
    %c0_12 = arith.constant 0 : index
    %c0_13 = arith.constant 0 : index
    %26 = vector.load %arg3[%c0_10, %c0_11, %c0_12, %c0_13] : memref<1x2x8x128xf32, #tpu.memory_space<vmem>>, vector<1x1x8x128xf32>
    %27 = vector.shape_cast %26 : vector<1x1x8x128xf32> to vector<8x128xf32>
    %28 = vector.shape_cast %22 : vector<8x128xf32> to vector<1x1x8x128xf32>
    tpu.vector_store %arg3[%c0_10, %c0_11, %c0_12, %c0_13], %28 {strides = array<i32>} : memref<1x2x8x128xf32, #tpu.memory_space<vmem>>, vector<1x1x8x128xf32>,
    %c0_14 = arith.constant 0 : index
    %c1 = arith.constant 1 : index
    %c0_15 = arith.constant 0 : index
    %c0_16 = arith.constant 0 : index
    %29 = vector.load %arg3[%c0_14, %c1, %c0_15, %c0_16] : memref<1x2x8x128xf32, #tpu.memory_space<vmem>>, vector<1x1x8x128xf32>
    %30 = vector.shape_cast %29 : vector<1x1x8x128xf32> to vector<8x128xf32>
    %31 = vector.shape_cast %25 : vector<8x128xf32> to vector<1x1x8x128xf32>
    tpu.vector_store %arg3[%c0_14, %c1, %c0_15, %c0_16], %31 {strides = array<i32>} : memref<1x2x8x128xf32, #tpu.memory_space<vmem>>, vector<1x1x8x128xf32>,
    return
  }
  func.func @transform_0(%arg0: i32) -> (i32, i32) {
    %c0_i32 = arith.constant 0 : i32
    %c0_i32_0 = arith.constant 0 : i32
    return %arg0, %c0_i32 : i32, i32
  }
  func.func @transform_1(%arg0: i32) -> (i32, i32) {
    %c0_i32 = arith.constant 0 : i32
    %c0_i32_0 = arith.constant 0 : i32
    return %arg0, %c0_i32 : i32, i32
  }
  func.func @transform_2(%arg0: i32) -> (i32, i32, i32, i32) {
    %c0_i32 = arith.constant 0 : i32
    %c0_i32_0 = arith.constant 0 : i32
    %c0_i32_1 = arith.constant 0 : i32
    %c0_i32_2 = arith.constant 0 : i32
    return %arg0, %c0_i32, %c0_i32_0, %c0_i32_1 : i32, i32, i32, i32
  }
}

</mosaic_0001>

<bundles_post_ra>
// kernel: tpu_custom_call.1
= control target key start
LH: loop header
LB: loop body
LE: loop exit
PB: predicated region body
PF: predicated region fallthrough
CT: control target
= control target key end

     0   :  { %7 = vsyncpa [#allocation3], 0  ;;  %s224_s0 = inlined_call_operand.hbm [shape: f32[16,128], index: 0, kind: input, shape index: {}]   ;;  %s225_s1 = inlined_call_operand.hbm [shape: f32[16,128], index: 1, kind: input, shape index: {}]   ;;  %s226_s2 = inlined_call_operand.hbm [shape: f32[1,2,8,128], index: 2, kind: output, shape index: {}]  }
   0x1   :  { %8 = vsyncpa [#allocation6], 0 }
   0x2   :  { %9 = vsyncpa [#allocation4], 0  ;;  %s14_s11 = sshll.u32 %s224_s0, 4  ;;  %s185_s12 = smov [#allocation2]   ;;  %s15_s11 = int_to_ptr.hbm [resolvable:$true] %s14_s11 }
   0x3   :  { %s16_s13 = sshll.u32 %s185_s12, 4  ;;  %s27_s16 = sshll.u32 %s225_s1, 4  ;;  %s17_s13 = int_to_ptr.vmem [resolvable:$true] %s16_s13  ;;  %s28_s16 = int_to_ptr.hbm [resolvable:$true] %s27_s16 }
   0x4   :  { %s186_s17 = smov 128   ;;  %s187_s18 = smov 8  }
   0x5   :  { %22 = dma.hbm_to_vmem [thread:$0]  %s15_s11, 256, %s17_s13, [#allocation3], %s186_s17, %s186_s17, %s187_s18  }
   0x6   :  { %s188_s19 = smov [#allocation5]  }
   0x7   :  { %s29_s20 = sshll.u32 %s188_s19, 4  ;;  %s30_s20 = int_to_ptr.vmem [resolvable:$true] %s29_s20 }
   0x8   :  { %35 = dma.hbm_to_vmem [thread:$0]  %s28_s16, 256, %s30_s20, [#allocation6], %s186_s17, %s186_s17, %s187_s18  }
   0x9   :  { %179 = dma.done.wait [#allocation3], 256  }
   0xa   :  { %180 = vsyncadd [#allocation3], 4294967040 }
   0xb   :  { %181 = dma.done.wait [#allocation6], 256  }
   0xc   :  { %182 = vsyncadd [#allocation6], 4294967040  ;;  %v44_v0 = vld [vmem:[#allocation2] sm:$0xff]  ;;  %v45_v1 = vld [vmem:[#allocation2 + $0x8] sm:$0xff]  ;;  %v189_v17 = vmov 0.0   ;;  %s190_s0 = smov [#allocation7]  }
   0xd   :  { %v46_v2 = vld [vmem:[#allocation5] sm:$0xff]  ;;  %v47_v3 = vld [vmem:[#allocation5 + $0x8] sm:$0xff]  ;;  %s83_s1 = sshll.u32 %s190_s0, 4  ;;  %s85_s23 = sshll.u32 %s226_s2, 4  ;;  %s84_s1 = int_to_ptr.vmem [resolvable:$true] %s83_s1  ;;  %s86_s23 = int_to_ptr.hbm [resolvable:$true] %s85_s23 }
   0xe   :  { %v48_v4 = vsub.f32 %v44_v0, %v46_v2  ;;  %v52_v5 = vadd.f32 1e-07, %v46_v2  ;;  %v49_v6 = vsub.f32 %v45_v1, %v47_v3  ;;  %v53_v7 = vadd.f32 1e-07, %v47_v3 }
  0x10   :  { %v50_v8 = vand.u32 2147483647, %v48_v4  ;;  %v54_v9 = vand.u32 2147483647, %v52_v5  ;;  %v51_v10 = vand.u32 2147483647, %v49_v6 }
  0x11   :  { %v55_v11 = vand.u32 2147483647, %v53_v7 }
  0x12   :  { %v56_v12 = vmul.f32 0.1, %v54_v9  ;;  %v60_v13 = vadd.f32 %v54_v9, %v50_v8 }
  0x13   :  { %v57_v14 = vmul.f32 0.1, %v55_v11  ;;  %v61_v15 = vadd.f32 %v55_v11, %v51_v10 }
  0x14   :  { %vm58_vm0 = vcmp.ge.f32.partialorder %v50_v8, %v56_v12  ;;  %vm62_vm1 = vcmp.gt.f32.partialorder %v60_v13, 0.0 }
  0x15   :  { %vm59_vm2 = vcmp.ge.f32.partialorder %v51_v10, %v57_v14  ;;  %vm63_vm3 = vcmp.gt.f32.partialorder %v61_v15, 0.0  ;;  %vm64_vm4 = vmand %vm58_vm0, %vm62_vm1 }
  0x16   :  { %vm65_vm5 = vmand %vm59_vm2, %vm63_vm3  ;;  %v66_v16 = vsel %vm64_vm4, %v50_v8, 0.0  ;;  %v99_v18 = vsel %vm64_vm4, 1.0, %v189_v17 }
  0x17   :  { %v67_v19 = vsel %vm65_vm5, %v51_v10, 0.0  ;;  %v100_v20 = vsel %vm65_vm5, 1.0, %v189_v17 }
  0x18   :  { %v72_v21 = vadd.f32 %v67_v19, %v66_v16  ;;  %v74_v22 = vadd.f32 %v100_v20, %v99_v18 }
  0x1a   :  { %76 = vst [vmem:[#allocation7] sm:$0xff] %v72_v21 }
  0x1b   :  { %78 = vst [vmem:[#allocation7 + $0x8] sm:$0xff] %v74_v22 }
  0x1c   :  { %91 = dma.vmem_to_hbm [thread:$0]  %s84_s1, 256, %s86_s23, [#allocation4], %s186_s17, %s186_s17, %s187_s18  }
  0x1d   :  { %183 = dma.done.wait [#allocation4], 256  }
  0x1e   :  { %184 = vsyncadd [#allocation4], 4294967040 }
  0x1f   :  { %96 = vsyncpa [#allocation3], 1 }
  0x20   :  { %97 = vsyncpa [#allocation6], 1 }
  0x21   :  { %98 = vsyncpa [#allocation4], 1 }

</bundles_post_ra>
